<compile_context>
chip_gen: v7x
topology: tpu7x:2x2x1
jax: 0.10.0
libtpu: 0.0.40
codegen_flags: <defaults>
</compile_context>

<pallas_src>
import functools

import jax
import jax.numpy as jnp
import numpy as np
from jax.experimental import pallas as pl
from jax.experimental.pallas import tpu as pltpu

NOLA_EPS = 1e-11  # torch.istft's window-envelope threshold.


def _round_up(x, m):
    return ((x + m - 1) // m) * m


# ------------------------------- Pallas kernel --------------------------------


def _istft_ola_kernel(C, TT, CR, hop,
                      spec_ref, br_ref, bi_ref, envr_ref,
                      y_ref, d_ref, carry_ref):
    """Fused irfft+window matmul, in-VMEM overlap-add, envelope scaling.

    spec_ref : (1, 2, TT, F)  real/imag spectrogram frames for this tile
    br/bi    : (F, win)       window-folded inverse-rDFT basis (real / imag part)
    envr_ref : (TT, hop)      1 / overlap-added window^2 envelope for these rows
    y_ref    : (1, TT, hop)   output; row s holds audio samples [s*hop, (s+1)*hop)
    d_ref    : VMEM scratch (>= TT+CR, hop)  per-tile overlap-add workspace
    carry_ref: VMEM scratch (>= CR, hop)     overlap spilling into later tiles
    """
    t = pl.program_id(1)

    @pl.when(t == 0)
    def _():
        carry_ref[...] = jnp.zeros_like(carry_ref)

    # irfft (onesided, 1/n_fft norm) fused with the synthesis window: two MXU
    # matmuls sharing one f32 accumulator -> windowed time frames (TT, win).
    frames = (
        jnp.dot(spec_ref[0, 0], br_ref[...], preferred_element_type=jnp.float32)
        + jnp.dot(spec_ref[0, 1], bi_ref[...], preferred_element_type=jnp.float32)
    )

    # Overlap-add inside the tile.  With hop | win and C = win // hop, output
    # row s (samples [s*hop, (s+1)*hop)) collects chunk c of frame s - c:
    #   d[s, :] = sum_c frames[s - c, c*hop:(c+1)*hop]
    d_ref[...] = jnp.zeros_like(d_ref)
    if CR > 0:
        d_ref[0:CR, :] = carry_ref[0:CR, :]          # spill from previous tiles
    for c in range(C):                                # C is small & static -> unrolled
        d_ref[c:c + TT, :] += frames[:, c * hop:(c + 1) * hop]

    # Rows [0, TT) are now complete: scale by 1/envelope and emit.
    y_ref[0] = d_ref[0:TT, :] * envr_ref[...]

    # Rows [TT, TT+CR) spill into the following tile(s).
    if CR > 0:
        carry_ref[0:CR, :] = d_ref[TT:TT + CR, :]


# ------------------------------ static precompute ------------------------------


def _hann_periodic(win):
    n = np.arange(win, dtype=np.float64)
    return 0.5 - 0.5 * np.cos(2.0 * np.pi * n / win)   # == torch.hann_window(win)


def _istft_basis(win, n_freq):
    """(F, win) real/imag inverse-rFFT operators with the 1/win norm and the
    synthesis window folded in, matching torch.istft's `irfft(spec_t) * window`."""
    n = np.arange(win, dtype=np.float64)
    k = np.arange(n_freq, dtype=np.float64)
    window = _hann_periodic(win)
    wk = np.full(n_freq, 2.0)
    wk[0] = 1.0                      # DC appears once in the Hermitian extension
    if win % 2 == 0:
        wk[-1] = 1.0                 # Nyquist bin appears once
    ang = 2.0 * np.pi * np.outer(k, n) / win
    br = (wk[:, None] * np.cos(ang) / win) * window[None, :]
    bi = (-wk[:, None] * np.sin(ang) / win) * window[None, :]   # 0 at DC/Nyquist
    return br, bi, window


def _ola_envelope_recip(window, win, hop, n_frames, n_rows):
    """1 / sum_t window[m - t*hop]^2 laid out as (n_rows, hop); 0 where the
    envelope is below torch's NOLA threshold (those samples get trimmed away)."""
    C = win // hop
    wsq = (window ** 2).reshape(C, hop)
    env = np.zeros(n_rows * hop, dtype=np.float64)
    for c in range(C):
        env[c * hop: c * hop + n_frames * hop] += np.tile(wsq[c], n_frames)
    recip = np.where(env > NOLA_EPS, 1.0 / np.maximum(env, NOLA_EPS), 0.0)
    return recip.reshape(n_rows, hop)


# ---------------------------------- wrapper ------------------------------------


def stft_decoder_forward(x, win, hop, length):
    """Pallas forward of STFTDecoder (defaults: kernel_size=-1, causal=False).

    x      : (B, n_src, 2, T, F) float32 real/imag spectrogram features.
    returns: (B, n_src, length) float32 audio.
    """
    B, n_src, two, T, F = x.shape
    assert two == 2, "decoder == Identity expects 2 channels (real, imag)"
    assert F == win // 2 + 1, "onesided spectrogram expected"
    assert win % hop == 0, "kernel assumes hop divides win (true for RTFS-Net)"
    # TODO(synk): general torch.istft hop (hop not dividing win) is not covered.

    BN = B * n_src
    C = win // hop            # frames overlapping one hop-sized output row
    CR = C - 1                # overlap rows carried into later tiles

    # Frame-tile size: a multiple of 8 that divides the padded frame count.
    T8 = _round_up(T, 8)
    TT = next(c for c in (512, 256, 128, 64, 32, 16, 8) if T8 % c == 0)
    n_flush = -(-CR // TT) if CR > 0 else 0     # zero tiles that flush the carry
    T_grid = T8 + n_flush * TT
    NT = T_grid // TT

    # Zero-pad frames: padded frames synthesize exact zeros, so the valid
    # overlap-add region is untouched; they just flush the carry scratch.
    spec = x.reshape(BN, 2, T, F).astype(jnp.float32)
    spec = jnp.pad(spec, ((0, 0), (0, 0), (0, T_grid - T), (0, 0)))

    br, bi, window = _istft_basis(win, F)
    env_recip = _ola_envelope_recip(window, win, hop, T, T_grid)
    br = jnp.asarray(br, jnp.float32)
    bi = jnp.asarray(bi, jnp.float32)
    env_recip = jnp.asarray(env_recip, jnp.float32)
    # TODO(synk): optional bf16 basis/spec (v6e/v7x MXU) once accuracy budget is known.

    d_rows = _round_up(TT + CR, 8)
    c_rows = _round_up(max(CR, 1), 8)

    y = pl.pallas_call(
        functools.partial(_istft_ola_kernel, C, TT, CR, hop),
        out_shape=jax.ShapeDtypeStruct((BN, T_grid, hop), jnp.float32),
        grid=(BN, NT),
        in_specs=[
            pl.BlockSpec((1, 2, TT, F), lambda b, t: (b, 0, t, 0)),   # spec tile
            pl.BlockSpec((F, win), lambda b, t: (0, 0)),              # basis (real)
            pl.BlockSpec((F, win), lambda b, t: (0, 0)),              # basis (imag)
            pl.BlockSpec((TT, hop), lambda b, t: (t, 0)),             # 1/envelope
        ],
        out_specs=pl.BlockSpec((1, TT, hop), lambda b, t: (b, t, 0)),
        scratch_shapes=[
            pltpu.VMEM((d_rows, hop), jnp.float32),   # overlap-add workspace
            pltpu.VMEM((c_rows, hop), jnp.float32),   # cross-tile carry
        ],
        compiler_params=pltpu.CompilerParams(
            dimension_semantics=("parallel", "arbitrary"),
        ),
    )(spec, br, bi, env_recip)

    # center=True trimming + cut/pad to `length` (cheap glue on the final audio).
    y = y.reshape(BN, T_grid * hop)
    start = win // 2
    take = min(length, max(T_grid * hop - start, 0))
    out = y[:, start:start + take]
    if take < length:
        out = jnp.pad(out, ((0, 0), (0, length - take)))
    return out.reshape(B, n_src, length)


# ------------------------------ pure-JAX reference ------------------------------


def reference_forward(x, win, hop, length):
    """torch.istft semantics via explicit per-frame overlap-add (independent of
    the kernel's tiling / carry logic)."""
    B, n_src, _, T, F = x.shape
    BN = B * n_src
    br, bi, window = _istft_basis(win, F)
    br = jnp.asarray(br, jnp.float32)
    bi = jnp.asarray(bi, jnp.float32)
    wsq = jnp.asarray(window ** 2, jnp.float32)

    r = x[:, :, 0].reshape(BN * T, F).astype(jnp.float32)
    i = x[:, :, 1].reshape(BN * T, F).astype(jnp.float32)
    wf = (jnp.dot(r, br) + jnp.dot(i, bi)).reshape(BN, T, win)  # windowed frames

    full_len = (T - 1) * hop + win
    num = jnp.zeros((BN, full_len), jnp.float32)
    den = jnp.zeros((full_len,), jnp.float32)
    for t in range(T):
        num = num.at[:, t * hop: t * hop + win].add(wf[:, t])
        den = den.at[t * hop: t * hop + win].add(wsq)
    y = num * jnp.where(den > NOLA_EPS, 1.0 / jnp.maximum(den, NOLA_EPS), 0.0)

    start = win // 2
    take = min(length, full_len - start)
    out = y[:, start:start + take]
    if take < length:
        out = jnp.pad(out, ((0, 0), (0, length - take)))
    return out.reshape(B, n_src, length)


# ------------------------------------ main --------------------------------------

if __name__ == "__main__":
    win, hop = 16, 8
    B, n_src = 2, 2
    length = 64
    T = 1 + length // hop          # what the paired STFT encoder produces
    F = win // 2 + 1

    # Validate the closed-form basis against numpy's irfft (the exact per-frame
    # operator torch.istft applies), in float64.
    br_np, bi_np, window_np = _istft_basis(win, F)
    br_fft = np.fft.irfft(np.eye(F), n=win, axis=-1) * window_np[None, :]
    bi_fft = np.fft.irfft(1j * np.eye(F), n=win, axis=-1) * window_np[None, :]
    np.testing.assert_allclose(br_np, br_fft, atol=1e-9)
    np.testing.assert_allclose(bi_np, bi_fft, atol=1e-9)

    key = jax.random.PRNGKey(0)
    x = jax.random.normal(key, (B, n_src, 2, T, F), dtype=jnp.float32)

    fwd = jax.jit(stft_decoder_forward, static_argnums=(1, 2, 3))
    out = jax.block_until_ready(fwd(x, win, hop, length))

    ref = reference_forward(x, win, hop, length)
    # Tolerance accounts for the MXU's default (bf16-operand) matmul rounding.
    np.testing.assert_allclose(np.asarray(out), np.asarray(ref),
                               rtol=1e-3, atol=1e-3)
    print("KERNEL_OK")
</pallas_src>

<mosaic_0001>
module attributes {stable_mosaic.version = 11 : i64} {
  func.func @_istft_ola_kernel(%arg0: i32, %arg1: i32, %arg2: memref<1x2x16x9xf32, #tpu.memory_space<vmem>>, %arg3: memref<9x16xf32, #tpu.memory_space<vmem>>, %arg4: memref<9x16xf32, #tpu.memory_space<vmem>>, %arg5: memref<16x8xf32, #tpu.memory_space<vmem>>, %arg6: memref<1x16x8xf32, #tpu.memory_space<vmem>>, %arg7: memref<24x8xf32, #tpu.memory_space<vmem>>, %arg8: memref<8x8xf32, #tpu.memory_space<vmem>>) attributes {dimension_semantics = [#tpu.dimension_semantics<parallel>, #tpu.dimension_semantics<arbitrary>], iteration_bounds = array<i64: 4, 2>, scalar_prefetch = 0 : i64, scratch_operands = 2 : i64, tpu.core_type = #tpu.core_type<tc>, window_params = [{transform_indices = @transform_0, window_bounds = array<i64: 1, 2, 16, 9>}, {pipeline_mode = #tpu.pipeline_mode<synchronous>, transform_indices = @transform_1, window_bounds = array<i64: 9, 16>}, {pipeline_mode = #tpu.pipeline_mode<synchronous>, transform_indices = @transform_2, window_bounds = array<i64: 9, 16>}, {transform_indices = @transform_3, window_bounds = array<i64: 16, 8>}, {transform_indices = @transform_4, window_bounds = array<i64: 1, 16, 8>}]} {
    %c0_i32 = arith.constant 0 : i32
    %0 = arith.cmpi eq, %arg1, %c0_i32 : i32
    %1 = arith.extui %0 : i1 to i32
    %c0_i32_0 = arith.constant 0 : i32
    %2 = arith.cmpi ne, %1, %c0_i32_0 : i32
    scf.if %2 {
      %cst_37 = arith.constant 0.000000e+00 : f32
      %32 = vector.broadcast %cst_37 : f32 to vector<8x8xf32>
      %c0_38 = arith.constant 0 : index
      %c0_39 = arith.constant 0 : index
      %33 = vector.load %arg8[%c0_38, %c0_39] : memref<8x8xf32, #tpu.memory_space<vmem>>, vector<8x8xf32>
      tpu.vector_store %arg8[%c0_38, %c0_39], %32 {strides = array<i32>} : memref<8x8xf32, #tpu.memory_space<vmem>>, vector<8x8xf32>,
    } else {
    }
    %c0 = arith.constant 0 : index
    %c0_1 = arith.constant 0 : index
    %c0_2 = arith.constant 0 : index
    %c0_3 = arith.constant 0 : index
    %3 = vector.load %arg2[%c0, %c0_1, %c0_2, %c0_3] : memref<1x2x16x9xf32, #tpu.memory_space<vmem>>, vector<1x1x16x9xf32>
    %4 = vector.shape_cast %3 : vector<1x1x16x9xf32> to vector<16x9xf32>
    %c0_4 = arith.constant 0 : index
    %c0_5 = arith.constant 0 : index
    %5 = vector.load %arg3[%c0_4, %c0_5] : memref<9x16xf32, #tpu.memory_space<vmem>>, vector<9x16xf32>
    %cst = arith.constant dense<0.000000e+00> : vector<16x16xf32>
    %6 = tpu.matmul %4, %5, %cst {dimension_numbers = #tpu.dot_dimension_numbers<[1], [0], [0], [1], [0, 0, 1, 1], [], []>} : vector<16x9xf32>, vector<9x16xf32>, vector<16x16xf32> -> vector<16x16xf32>
    %c0_6 = arith.constant 0 : index
    %c1 = arith.constant 1 : index
    %c0_7 = arith.constant 0 : index
    %c0_8 = arith.constant 0 : index
    %7 = vector.load %arg2[%c0_6, %c1, %c0_7, %c0_8] : memref<1x2x16x9xf32, #tpu.memory_space<vmem>>, vector<1x1x16x9xf32>
    %8 = vector.shape_cast %7 : vector<1x1x16x9xf32> to vector<16x9xf32>
    %c0_9 = arith.constant 0 : index
    %c0_10 = arith.constant 0 : index
    %9 = vector.load %arg4[%c0_9, %c0_10] : memref<9x16xf32, #tpu.memory_space<vmem>>, vector<9x16xf32>
    %cst_11 = arith.constant dense<0.000000e+00> : vector<16x16xf32>
    %10 = tpu.matmul %8, %9, %cst_11 {dimension_numbers = #tpu.dot_dimension_numbers<[1], [0], [0], [1], [0, 0, 1, 1], [], []>} : vector<16x9xf32>, vector<9x16xf32>, vector<16x16xf32> -> vector<16x16xf32>
    %11 = arith.addf %6, %10 : vector<16x16xf32>
    %cst_12 = arith.constant 0.000000e+00 : f32
    %12 = vector.broadcast %cst_12 : f32 to vector<24x8xf32>
    %c0_13 = arith.constant 0 : index
    %c0_14 = arith.constant 0 : index
    %13 = vector.load %arg7[%c0_13, %c0_14] : memref<24x8xf32, #tpu.memory_space<vmem>>, vector<24x8xf32>
    tpu.vector_store %arg7[%c0_13, %c0_14], %12 {strides = array<i32>} : memref<24x8xf32, #tpu.memory_space<vmem>>, vector<24x8xf32>,
    %c0_15 = arith.constant 0 : index
    %c0_16 = arith.constant 0 : index
    %14 = vector.load %arg8[%c0_15, %c0_16] : memref<8x8xf32, #tpu.memory_space<vmem>>, vector<1x8xf32>
    %c0_17 = arith.constant 0 : index
    %c0_18 = arith.constant 0 : index
    %15 = vector.load %arg7[%c0_17, %c0_18] : memref<24x8xf32, #tpu.memory_space<vmem>>, vector<1x8xf32>
    tpu.vector_store %arg7[%c0_17, %c0_18], %14 {strides = array<i32>} : memref<24x8xf32, #tpu.memory_space<vmem>>, vector<1x8xf32>,
    %c0_19 = arith.constant 0 : index
    %c0_20 = arith.constant 0 : index
    %16 = vector.load %arg7[%c0_19, %c0_20] : memref<24x8xf32, #tpu.memory_space<vmem>>, vector<16x8xf32>
    %17 = vector.extract_strided_slice %11 {offsets = [0, 0], sizes = [16, 8], strides = [1, 1]} : vector<16x16xf32> to vector<16x8xf32>
    %18 = arith.addf %16, %17 : vector<16x8xf32>
    %c0_21 = arith.constant 0 : index
    %c0_22 = arith.constant 0 : index
    %19 = vector.load %arg7[%c0_21, %c0_22] : memref<24x8xf32, #tpu.memory_space<vmem>>, vector<16x8xf32>
    tpu.vector_store %arg7[%c0_21, %c0_22], %18 {strides = array<i32>} : memref<24x8xf32, #tpu.memory_space<vmem>>, vector<16x8xf32>,
    %c1_23 = arith.constant 1 : index
    %c0_24 = arith.constant 0 : index
    %20 = vector.load %arg7[%c1_23, %c0_24] : memref<24x8xf32, #tpu.memory_space<vmem>>, vector<16x8xf32>
    %21 = vector.extract_strided_slice %11 {offsets = [0, 8], sizes = [16, 8], strides = [1, 1]} : vector<16x16xf32> to vector<16x8xf32>
    %22 = arith.addf %20, %21 : vector<16x8xf32>
    %c1_25 = arith.constant 1 : index
    %c0_26 = arith.constant 0 : index
    %23 = vector.load %arg7[%c1_25, %c0_26] : memref<24x8xf32, #tpu.memory_space<vmem>>, vector<16x8xf32>
    tpu.vector_store %arg7[%c1_25, %c0_26], %22 {strides = array<i32>} : memref<24x8xf32, #tpu.memory_space<vmem>>, vector<16x8xf32>,
    %c0_27 = arith.constant 0 : index
    %c0_28 = arith.constant 0 : index
    %24 = vector.load %arg7[%c0_27, %c0_28] : memref<24x8xf32, #tpu.memory_space<vmem>>, vector<16x8xf32>
    %c0_29 = arith.constant 0 : index
    %c0_30 = arith.constant 0 : index
    %25 = vector.load %arg5[%c0_29, %c0_30] : memref<16x8xf32, #tpu.memory_space<vmem>>, vector<16x8xf32>
    %26 = arith.mulf %24, %25 : vector<16x8xf32>
    %c0_31 = arith.constant 0 : index
    %c0_32 = arith.constant 0 : index
    %c0_33 = arith.constant 0 : index
    %27 = vector.load %arg6[%c0_31, %c0_32, %c0_33] : memref<1x16x8xf32, #tpu.memory_space<vmem>>, vector<1x16x8xf32>
    %28 = vector.shape_cast %27 : vector<1x16x8xf32> to vector<16x8xf32>
    %29 = vector.shape_cast %26 : vector<16x8xf32> to vector<1x16x8xf32>
    tpu.vector_store %arg6[%c0_31, %c0_32, %c0_33], %29 {strides = array<i32>} : memref<1x16x8xf32, #tpu.memory_space<vmem>>, vector<1x16x8xf32>,
    %c16 = arith.constant 16 : index
    %c0_34 = arith.constant 0 : index
    %30 = vector.load %arg7[%c16, %c0_34] : memref<24x8xf32, #tpu.memory_space<vmem>>, vector<1x8xf32>
    %c0_35 = arith.constant 0 : index
    %c0_36 = arith.constant 0 : index
    %31 = vector.load %arg8[%c0_35, %c0_36] : memref<8x8xf32, #tpu.memory_space<vmem>>, vector<1x8xf32>
    tpu.vector_store %arg8[%c0_35, %c0_36], %30 {strides = array<i32>} : memref<8x8xf32, #tpu.memory_space<vmem>>, vector<1x8xf32>,
    return
  }
  func.func @transform_0(%arg0: i32, %arg1: i32) -> (i32, i32, i32, i32) {
    %c0_i32 = arith.constant 0 : i32
    %c0_i32_0 = arith.constant 0 : i32
    %c0_i32_1 = arith.constant 0 : i32
    return %arg0, %c0_i32, %arg1, %c0_i32_0 : i32, i32, i32, i32
  }
  func.func @transform_1(%arg0: i32, %arg1: i32) -> (i32, i32) {
    %c0_i32 = arith.constant 0 : i32
    %c0_i32_0 = arith.constant 0 : i32
    %c0_i32_1 = arith.constant 0 : i32
    return %c0_i32, %c0_i32_0 : i32, i32
  }
  func.func @transform_2(%arg0: i32, %arg1: i32) -> (i32, i32) {
    %c0_i32 = arith.constant 0 : i32
    %c0_i32_0 = arith.constant 0 : i32
    %c0_i32_1 = arith.constant 0 : i32
    return %c0_i32, %c0_i32_0 : i32, i32
  }
  func.func @transform_3(%arg0: i32, %arg1: i32) -> (i32, i32) {
    %c0_i32 = arith.constant 0 : i32
    %c0_i32_0 = arith.constant 0 : i32
    return %arg1, %c0_i32 : i32, i32
  }
  func.func @transform_4(%arg0: i32, %arg1: i32) -> (i32, i32, i32) {
    %c0_i32 = arith.constant 0 : i32
    %c0_i32_0 = arith.constant 0 : i32
    return %arg0, %arg1, %c0_i32 : i32, i32, i32
  }
}

</mosaic_0001>

<bundles_post_ra>
// kernel: stft_decoder_forward.1
= control target key start
LH: loop header
LB: loop body
LE: loop exit
PB: predicated region body
PF: predicated region fallthrough
CT: control target
= control target key end

     0   :  { %s829_s15 = smov 0   ;;  %s831_s16 = smov 0   ;;  %s954_s0 = inlined_call_operand.vmem [shape: f32[4,2,32,9], index: 0, kind: input, shape index: {}]   ;;  %s955_s1 = inlined_call_operand.vmem [shape: f32[9,16], index: 1, kind: input, shape index: {}]   ;;  %s956_s2 = inlined_call_operand.vmem [shape: f32[9,16], index: 2, kind: input, shape index: {}]   ;;  %s957_s3 = inlined_call_operand.vmem [shape: f32[32,8], index: 3, kind: input, shape index: {}]   ;;  %s958_s4 = inlined_call_operand.vmem [shape: f32[4,32,8], index: 4, kind: output, shape index: {}]  }
   0x1   :  { %s833_s17 = smov 0   ;;  %s835_s18 = smov 0  }
   0x2   :  { %s837_s19 = smov 0   ;;  %s839_s20 = smov 0  }
   0x3   :  { %s841_s21 = smov 0  }
   0x4 LB: > { %s23_s22 = sadd.s32 1, %s790_s19  ;;  %s26_s23 = sadd.s32 1, %s794_s20  ;;  %s798_s21 = sphi %s841_s21, %s14_s21   ;;  %s794_s20 = sphi %s839_s20, %s964_s20   ;;  %s790_s19 = sphi %s837_s19, %s963_s19   ;;  %s786_s18 = sphi %s835_s18, %s962_s18   ;;  %s782_s17 = sphi %s833_s17, %s961_s17   ;;  %s778_s16 = sphi %s831_s16, %s960_s16   ;;  %s774_s15 = sphi %s829_s15, %s959_s15  }
   0x5   : > { %p24_p0 = scmp.ge.s32.totalorder %s23_s22, 2  ;;  %p42_p1 = scmp.ne.s32.totalorder %s778_s16, %s774_s15 }
   0x6   : > { %p43_p2 = scmp.eq.s32.totalorder %s798_s21, 0  ;;  %s35_s27 = sadd.s32 1, %s778_s16 }
   0x7   : > { %s966_s22 = smov (%p24_p0, %s23_s22), 0  ;;  %s968_s23 = smov (!%p24_p0, %s26_s23), %s794_s20 }
   0x8   : > { %p44_p3 = por %p43_p2, %p42_p1  ;;  %p28_p4 = scmp.ge.s32.totalorder %s968_s23, 4 }
   0x9   : > { %s31_s24 = ssub.s32 %s790_s19, %s966_s22  ;;  %p625_p6 = scmp.ge.s32.totalorder %s798_s21, 8 }
   0xa   : > { %s970_s23 = smov (%p28_p4, %s968_s23), 0 }
   0xb   : > { %s30_s25 = ssub.s32 %s794_s20, %s970_s23  ;;  %170 = sbr.rel (%p625_p6) target bundleno = 27 (0x1b), region = 24 }
   0xc   : > { %s32_s26 = sor.u32 %s31_s24, %s30_s25 }
   0xd   : > { %p33_p5 = scmp.eq.s32.totalorder %s32_s26, 0 }
   0xf   : > { %s880_s28 = scalar_select %p33_p5, %s778_s16, %s35_s27  }
  0x12   : > { %173 = sbr.rel (!%p44_p3) target bundleno = 27 (0x1b), region = 28  ;;  %s175_s29 = sand.u32 (%p44_p3), 1, %s778_s16  }
  0x13   : > { %s627_s30 = sshll.u32 (%p44_p3), %s790_s19, 1  ;;  %s626_s5 = sshll.u32 (%p44_p3), %s175_s29, 5 }
  0x14   : > { %s628_s6 = sshll.u32 (%p44_p3), %s794_s20, 3  ;;  %s177_s12 = scalar_lea.vmem (%p44_p3), [#allocation4], %s626_s5 }
  0x15   : > { %s180_s7 = sadd.s32 (%p44_p3), %s628_s6, %s627_s30 }
  0x16   : > { %s629_s8 = sshll.u32 (%p44_p3), %s180_s7, 3 }
  0x17   : > { %s182_s11 = scalar_lea.vmem (%p44_p3), %s954_s0, %s629_s8 }
  0x18   : > { %v216_v0 = vld [vmem:[%s182_s11] sm:$0xff] (%p44_p3)  ;;  %v218_v1 = vld [vmem:[%s182_s11 + $0x8] sm:$0xff] (%p44_p3) }
  0x19   : > { %v220_v2 = vld [vmem:[%s182_s11 + $0x20] sm:$0xff]  ;;  %217 = vst [vmem:[%s177_s12] sm:$0xff] %v216_v0  ;;  %219 = vst [vmem:[%s177_s12 + $0x8] sm:$0xff] %v218_v1  ;;  %v222_v3 = vld [vmem:[%s182_s11 + $0x28] sm:$0xff] }
  0x1a   : > { %221 = vst [vmem:[%s177_s12 + $0x10] sm:$0xff] %v220_v2  ;;  %223 = vst [vmem:[%s177_s12 + $0x18] sm:$0xff] %v222_v3 }
  0x1b PF: > { %p630_p7 = scmp.ge.s32.totalorder %s798_s21, 1  ;;  %p237_p8 = scmp.lt.s32.totalorder %s798_s21, 9 }
  0x1d   : > { %p238_p9 = pnand %p630_p7, %p237_p8 }
  0x1e   : > { %s244_s13 = sand.u32 (!%p238_p9), 1, %s774_s15   ;;  %s632_s14 = sshll.u32 (!%p238_p9), %s782_s17, 1 }
  0x1f   : > { %241 = sbr.rel (%p238_p9) target bundleno = 403 (0x193), region = 70  ;;  %s631_s24 = sshll.u32 (!%p238_p9), %s244_s13, 5 }
  0x20   : > { %p280_p10 = scmp.lt.s32.totalorder (!%p238_p9), %s632_s14, 3  ;;  %p286_p11 = scmp.lt.s32.totalorder (!%p238_p9), %s786_s18, 3 }
  0x21   : > { %s246_s15 = scalar_lea.vmem (!%p238_p9), [#allocation4], %s631_s24  ;;  %p637_p12 = scmp.ne.s32.totalorder (!%p238_p9), %s782_s17, 0 }
  0x26   : > { %s972_s14 = smov (!%p280_p10, %s632_s14), 3  ;;  %s974_s18 = smov (!%p286_p11, %s786_s18), 3 }
  0x27   : > { %s633_s25 = sshll.u32 %s972_s14, 3  ;;  %s635_s30 = sshll.u32 %s974_s18, 2  ;;  %vm299_vm0 = vcmask (!%p637_p12), 64512   ;;  %v800_v4 = vmov (!%p637_p12), 0.0  }
  0x28   : > { %s898_s29 = scalar_lea.vmem %s957_s3, %s633_s25  ;;  %s291_s5 = sadd.s32 %s635_s30, %s972_s14  ;;  %300 = vst.msk [vmem:[#allocation3] sm:$0xff] (!%p637_p12), %vm299_vm0, %v800_v4 }
  0x29   : > { %s636_s6 = sshll.u32 %s291_s5, 3  ;;  %298 = sbr.rel (%p637_p12) target bundleno = 48 (0x30), region = 78 }
  0x2a   : > { %s903_s9 = scalar_lea.vmem %s958_s4, %s636_s6 }
  0x30 PF: > { %v308_v5 = vld [vmem:[%s956_s2] sm:$0xff]  ;;  %v309_v6 = vld [vmem:[%s956_s2 + $0x8] sm:$0x1]  ;;  %vm317_vm1 = vcmask 1040384   ;;  %vm801_vm2 = vmmov 1   ;;  %v638_v10 = vld [vmem:[%s246_s15 + $0x10] sm:$0xff] }
  0x31   : > { %v303_v7 = vld [vmem:[%s955_s1] sm:$0xff]  ;;  %v670_v8 = vpack.c.bf16 %v309_v6, %v308_v5  ;;  %vm671_vm3 = vmpackc.low %vm317_vm1, %vm801_vm2  ;;  %v304_v9 = vld [vmem:[%s955_s1 + $0x8] sm:$0x1]  ;;  %vm310_vm4 = vcmask 72704   ;;  %vm480_vm5 = vcmask 64512   ;;  %v802_v15 = vmov 0.0  }
  0x32   : > { %v676_v11 = vpack.c.bf16 %v304_v9, %v303_v7  ;;  %660 = vmatprep.mubr.msk.f32.mxu1 %vm310_vm4, %v638_v10  ;;  %v301_v12 = vld [vmem:[%s246_s15] sm:$0xff]  ;;  %v639_v13 = vld [vmem:[%s246_s15 + $0x18] sm:$0xff]  ;;  %v302_v14 = vld [vmem:[%s246_s15 + $0x8] sm:$0xff]  ;;  %482 = vst.msk [vmem:[#allocation2 + $0x8] sm:$0xff] %vm480_vm5, %v802_v15  ;;  %vm485_vm6 = vcmask 57344   ;;  %s803_s25 = smov 120  }
  0x33   : > { %672 = vmatprep.subr.msk.bf16.mxu1 %vm671_vm3, %v670_v8  ;;  %667 = vmatprep.mubr.msk.f32.mxu0 %vm310_vm4, %v301_v12  ;;  %481 = vst.msk [vmem:[#allocation2] sm:$0xff] %vm480_vm5, %v802_v15  ;;  %483 = vst.msk [vmem:[#allocation2 + $0x10] sm:$0xff] %vm480_vm5, %v802_v15  ;;  %v484_v16 = vld [vmem:[#allocation3] sm:$0x1]  ;;  %v509_v33 = vld [vmem:[%s898_s29] sm:$0xff] }
  0x34   : > { %678 = vmatprep.subr.msk.bf16.mxu0 %vm671_vm3, %v676_v11  ;;  %675 = vmatpush3.bf16.msk.msra.mxu1 %vm671_vm3, %v670_v8  ;;  %486 = vst.msk [vmem:[#allocation2] sm:$0x1] %vm485_vm6, %v484_v16  ;;  %v510_v36 = vld [vmem:[%s898_s29 + $0x8] sm:$0xff] }
  0x35   : > { %681 = vmatpush3.bf16.msk.msra.mxu0 %vm671_vm3, %v676_v11 }
  0x37   : > { %661 = vmatmul.mubr.msk.f32.vlgmr.msra.gmra.mrb[0].mxu1 %vm310_vm4, %v639_v13 }
  0x38   : > { %668 = vmatmul.mubr.msk.f32.vlgmr.msra.gmra.mrb[0].mxu0 %vm310_vm4, %v302_v14 }
  0x39   : > { %v488_v19 = vld [vmem:[#allocation2 + $0x8] sm:$0xff] }
  0x3b   : > { %v487_v23 = vld [vmem:[#allocation2] sm:$0xff] }
 0x10a   : > { %v662_v17 = vpop.f32.mrb[0].mxu1 }
 0x10b   : > { %v669_v18 = vpop.f32.mrb[0].mxu0  ;;  %v387_v20 = vpop.f32.mrb[1].mxu1 }
 0x10c   : > { %v477_v21 = vadd.f32 %v669_v18, %v662_v17  ;;  %v471_v22 = vpop.f32.mrb[1].mxu0 }
 0x10d   : > { %v472_v24 = vadd.f32 %v471_v22, %v387_v20 }
 0x10e   : > { %v490_v25 = vadd.f32 %v488_v19, %v477_v21 }
 0x10f   : > { %v489_v26 = vadd.f32 %v487_v23, %v472_v24  ;;  %497 = vrot.lane.b32.xlu0 %v472_v24, %s803_s25 }
 0x110   : > { %492 = vst.msk [vmem:[#allocation2 + $0x8] sm:$0xff] %vm480_vm5, %v490_v25 }
 0x111   : > { %491 = vst.msk [vmem:[#allocation2] sm:$0xff] %vm480_vm5, %v489_v26 }
 0x113   : > { %499 = vrot.lane.b32.xlu0 %v477_v21, %s803_s25 }
 0x117   : > { %v494_v30 = vld [vmem:[#allocation2 + $0x9] sm:$0xff] }
 0x118   : > { %v493_v28 = vld [vmem:[#allocation2 + $0x1] sm:$0xff] }
 0x181   : > { %v498_v27 = vpop.permute.xlu0 %497 }
 0x182   : > { %v503_v29 = vadd.f32 %v498_v27, %v493_v28 }
 0x184   : > { %505 = vst.msk [vmem:[#allocation2 + $0x1] sm:$0xff] %vm480_vm5, %v503_v29 }
 0x185   : > { %v500_v31 = vpop.permute.xlu0 %499 }
 0x186   : > { %v504_v32 = vadd.f32 %v500_v31, %v494_v30 }
 0x188   : > { %506 = vst.msk [vmem:[#allocation2 + $0x9] sm:$0xff] %vm480_vm5, %v504_v32 }
 0x18b   : > { %v507_v34 = vld [vmem:[#allocation2] sm:$0xff] }
 0x18c   : > { %v511_v35 = vmul.f32 %v509_v33, %v507_v34 }
 0x18e   : > { %513 = vst.msk [vmem:[%s903_s9] sm:$0xff] %vm480_vm5, %v511_v35 }
 0x18f   : > { %v508_v37 = vld [vmem:[#allocation2 + $0x8] sm:$0xff]  ;;  %v515_v38 = vld [vmem:[#allocation2 + $0x10] sm:$0x1] }
 0x190   : > { %v512_v39 = vmul.f32 %v510_v36, %v508_v37  ;;  %516 = vst.msk [vmem:[#allocation3] sm:$0x1] %vm485_vm6, %v515_v38 }
 0x192   : > { %514 = vst.msk [vmem:[%s903_s9 + $0x8] sm:$0xff] %vm480_vm5, %v512_v39 }
 0x193 PF: > { %s14_s21 = sadd.s32 1, %s798_s21   ;;  %s959_s15 = smov %s778_s16 }
 0x194   : > { %p11_p13 = scmp.ge.s32.totalorder %s14_s21, 10   ;;  %s960_s16 = smov %s880_s28 }
 0x195   : > { %s961_s17 = smov %s790_s19  ;;  %s962_s18 = smov %s794_s20 }
 0x196   : > { %s963_s19 = smov %s966_s22  ;;  %s964_s20 = smov %s970_s23 }
 0x197   :  { %13 = sbr.rel (!%p11_p13) target bundleno = 4 (0x4), region = 117 }

</bundles_post_ra>
